<compile_context>
chip_gen: v7x
topology: tpu7x:2x2x1
jax: 0.10.0
libtpu: 0.0.40
codegen_flags: <defaults>
</compile_context>

<pallas_src>
import math

import jax
import jax.numpy as jnp
from jax.experimental import pallas as pl
from jax.experimental.pallas import tpu as pltpu


def _round_up(x, m):
    return ((x + m - 1) // m) * m


def _cdiv(a, b):
    return -(-a // b)


def _drop_path_kernel(scale_ref, x_ref, o_ref):
    # scale_ref: (TB, 1) per-sample scale (0.0 or 1/keep_prob), in x dtype.
    # x_ref / o_ref: (TB, TN) sublane/lane-dense VMEM tile.
    o_ref[...] = x_ref[...] * scale_ref[...]


def _choose_tiles(B, N, itemsize):
    """Pick (TB, TN): dtype-native sublanes, lane-dense cols, ~2 MiB/step."""
    # Sub-32-bit dtypes pack along sublanes: 8 rows f32, 16 bf16, 32 int8/fp8
    # keep tiles native (rectangular DMAs, full-vreg vector ops).
    sub = {4: 8, 2: 16, 1: 32}.get(itemsize, 8)
    TB = min(_round_up(B, sub), 256)

    # Size the feature tile by bytes moved (~2 MiB target) rather than a
    # fixed cap, so the ~0.35 us per-step overhead is amortized even when B
    # (and hence TB) is small.
    target_bytes = 2 * 1024 * 1024
    tn_target = max(128, target_bytes // max(1, TB * itemsize))
    TN = min(_round_up(N, 128), _round_up(tn_target, 128))

    # v7x megacore: prefer >= 8 grid steps (2 TCs + pipeline depth) when the
    # tensor is large enough, but never shrink a tile below ~512 KiB.
    min_tile_bytes = 512 * 1024
    while (_cdiv(B, TB) * _cdiv(N, TN) < 8 and TN > 128
           and TB * (TN // 2) * itemsize >= min_tile_bytes):
        TN = _round_up(TN // 2, 128)
    return TB, TN


def drop_path(x, drop_prob=0.0, training=False, *, key=None, donate=False):
    """JAX/Pallas equivalent of the PyTorch drop_path function."""
    if drop_prob == 0.0 or not training:
        return x

    keep_prob = 1.0 - float(drop_prob)
    if keep_prob <= 0.0:
        # drop_prob == 1: every sample path is dropped (avoid 0-division).
        return jnp.zeros_like(x)
    if key is None:
        raise ValueError(
            "drop_path requires an explicit PRNG `key` in training mode; a "
            "fixed default key would silently reuse the same drop mask.")

    B = x.shape[0]
    N = math.prod(x.shape[1:])
    itemsize = jnp.dtype(x.dtype).itemsize

    # Per-sample Bernoulli(keep_prob) scaled by 1/keep_prob (tiny: B values,
    # computed once in the wrapper, broadcast inside the kernel).
    # Note: cast to x.dtype keeps the kernel multiply in the input dtype; for
    # bf16/fp8 inputs 1/keep_prob is rounded to that dtype (negligible for
    # training, but exact-compare tests should use the same rounded scale).
    rand = jax.random.uniform(key, (B,), dtype=jnp.float32)
    scale2d = (jnp.floor(keep_prob + rand) / keep_prob).astype(x.dtype)
    scale2d = scale2d.reshape(B, 1)

    TB, TN = _choose_tiles(B, N, itemsize)
    # Ragged edge blocks are masked by Pallas -> no jnp.pad / out-slice copies
    # (each would be an extra full HBM read+write pass on this mem-bound op).
    grid = (_cdiv(B, TB), _cdiv(N, TN))

    x2d = x.reshape(B, N)

    tile_bytes = TB * TN * itemsize
    # Double-buffered in + out tiles plus slack; cap at 48 MiB so the working
    # set stays safe on v7x's 64 MiB physical VMEM (v5e/v6e have 128 MiB).
    vmem_limit = int(min(48 * 1024 * 1024,
                         max(32 * 1024 * 1024, 6 * tile_bytes)))

    out2d = pl.pallas_call(
        _drop_path_kernel,
        out_shape=jax.ShapeDtypeStruct((B, N), x.dtype),
        grid=grid,
        in_specs=[
            # Scale block index is constant over j (innermost feature axis),
            # so it stays resident in VMEM across the inner sweep.
            pl.BlockSpec((TB, 1), lambda i, j: (i, 0)),
            pl.BlockSpec((TB, TN), lambda i, j: (i, j)),
        ],
        out_specs=pl.BlockSpec((TB, TN), lambda i, j: (i, j)),
        compiler_params=pltpu.CompilerParams(
            dimension_semantics=("parallel", "parallel"),
            vmem_limit_bytes=vmem_limit,
        ),
        # x is input index 1 (after scale2d); shapes/dtypes now match the
        # output, so donating x avoids a second B*N HBM allocation.
        input_output_aliases=({1: 0} if donate else {}),
    )(scale2d, x2d)

    return out2d.reshape(x.shape)


class DropPath:
    """Drop paths (Stochastic Depth) per sample."""

    def __init__(self, drop_prob=None):
        self.drop_prob = drop_prob
        self.training = True  # mirror nn.Module default training mode

    def __call__(self, x, key=None):
        return drop_path(x, self.drop_prob, self.training, key=key)


if __name__ == "__main__":
    key = jax.random.PRNGKey(0)
    kx, kmask = jax.random.split(key)

    # NCHW input, small shapes: batch=2, channels=4, spatial=16x16
    x = jax.random.normal(kx, (2, 4, 16, 16), dtype=jnp.float32)

    module = DropPath(drop_prob=0.25)
    module.training = True
    y_train = jax.block_until_ready(module(x, key=kmask))

    # Reference check: per-sample mask, scaled by 1/keep_prob.
    keep_prob = 1.0 - 0.25
    rand = jax.random.uniform(kmask, (2,), dtype=jnp.float32)
    mask = jnp.floor(keep_prob + rand) / keep_prob
    y_ref = x * mask.reshape(2, 1, 1, 1)
    assert jnp.allclose(y_train, y_ref, atol=1e-6), "training-mode mismatch"

    # drop_prob=1.0 must produce all-zeros (no divide-by-zero NaNs).
    y_all_dropped = jax.block_until_ready(
        drop_path(x, 1.0, True, key=kmask))
    assert jnp.allclose(y_all_dropped, jnp.zeros_like(x)), "drop_prob=1 mismatch"

    # Eval mode (or drop_prob=0) must be the identity.
    module.training = False
    y_eval = jax.block_until_ready(module(x))
    assert jnp.allclose(y_eval, x), "eval-mode mismatch"

    print("KERNEL_OK")
</pallas_src>

<mosaic_0001>
module attributes {stable_mosaic.version = 11 : i64} {
  func.func @_drop_path_kernel(%arg0: i32, %arg1: i32, %arg2: memref<8x1xf32, #tpu.memory_space<vmem>>, %arg3: memref<8x1024xf32, #tpu.memory_space<vmem>>, %arg4: memref<8x1024xf32, #tpu.memory_space<vmem>>) attributes {dimension_semantics = [#tpu.dimension_semantics<parallel>, #tpu.dimension_semantics<parallel>], iteration_bounds = array<i64: 1, 1>, scalar_prefetch = 0 : i64, scratch_operands = 0 : i64, tpu.core_type = #tpu.core_type<tc>, window_params = [{transform_indices = @transform_0, window_bounds = array<i64: 8, 1>}, {transform_indices = @transform_1, window_bounds = array<i64: 8, 1024>}, {transform_indices = @transform_2, window_bounds = array<i64: 8, 1024>}]} {
    %c0 = arith.constant 0 : index
    %c0_0 = arith.constant 0 : index
    %0 = vector.load %arg3[%c0, %c0_0] : memref<8x1024xf32, #tpu.memory_space<vmem>>, vector<8x1024xf32>
    %c0_1 = arith.constant 0 : index
    %c0_2 = arith.constant 0 : index
    %1 = vector.load %arg2[%c0_1, %c0_2] : memref<8x1xf32, #tpu.memory_space<vmem>>, vector<8x1xf32>
    %2 = vector.broadcast %1 : vector<8x1xf32> to vector<8x1024xf32>
    %3 = arith.mulf %0, %2 : vector<8x1024xf32>
    %c0_3 = arith.constant 0 : index
    %c0_4 = arith.constant 0 : index
    %4 = vector.load %arg4[%c0_3, %c0_4] : memref<8x1024xf32, #tpu.memory_space<vmem>>, vector<8x1024xf32>
    tpu.vector_store %arg4[%c0_3, %c0_4], %3 {strides = array<i32>} : memref<8x1024xf32, #tpu.memory_space<vmem>>, vector<8x1024xf32>,
    return
  }
  func.func @transform_0(%arg0: i32, %arg1: i32) -> (i32, i32) {
    %c0_i32 = arith.constant 0 : i32
    %c0_i32_0 = arith.constant 0 : i32
    return %arg0, %c0_i32 : i32, i32
  }
  func.func @transform_1(%arg0: i32, %arg1: i32) -> (i32, i32) {
    %c0_i32 = arith.constant 0 : i32
    return %arg0, %arg1 : i32, i32
  }
  func.func @transform_2(%arg0: i32, %arg1: i32) -> (i32, i32) {
    %c0_i32 = arith.constant 0 : i32
    return %arg0, %arg1 : i32, i32
  }
}

</mosaic_0001>

<bundles_post_ra>
// kernel: tpu_custom_call.1
= control target key start
LH: loop header
LB: loop body
LE: loop exit
PB: predicated region body
PF: predicated region fallthrough
CT: control target
= control target key end

     0   :  { %7 = vsyncpa [#allocation3], 0  ;;  %s219_s0 = inlined_call_operand.vmem [shape: f32[2,1], index: 0, kind: input, shape index: {}]   ;;  %s220_s1 = inlined_call_operand.hbm [shape: f32[2,1024], index: 1, kind: input, shape index: {}]   ;;  %s221_s2 = inlined_call_operand.hbm [shape: f32[2,1024], index: 2, kind: output, shape index: {}]  }
   0x1   :  { %8 = vsyncpa [#allocation4], 0 }
   0x2   :  { %15 = vsyncadd [#allocation3], 768  ;;  %s162_s9 = smov [#allocation2]   ;;  %s114_s13 = scalar_lea.hbm %s220_s1, 256 }
   0x3   :  { %s16_s10 = sshll.u32 %s162_s9, 4  ;;  %p115_p0 = scmp.ne.s32.totalorder %s220_s1, %s114_s13  ;;  %s17_s10 = int_to_ptr.vmem [resolvable:$true] %s16_s10 }
   0x4   :  { %p118_p1 = scmp.lt.u32.totalorder %s114_s13, %s220_s1 }
   0x6   :  { %p120_p2 = pnand %p118_p1, %p115_p0 }
   0x8   :  { %123 = shalt.err (!%p120_p2)
}
   0x9   :  { %s124_s18 = scalar_lea.vmem %s17_s10, 256  ;;  %s128_s19 = scalar_lea.vmem %s17_s10, 1024 }
   0xa   :  { %p125_p3 = scmp.ne.s32.totalorder %s17_s10, %s124_s18  ;;  %p129_p4 = scmp.lt.s32.totalorder %s17_s10, %s17_s10 }
   0xb   :  { %p130_p5 = scmp.lt.s32.totalorder %s128_s19, %s124_s18 }
   0xd   :  { %p131_p6 = por %p130_p5, %p129_p4 }
   0xf   :  { %p132_p7 = pnand %p131_p6, %p125_p3 }
  0x11   :  { %135 = shalt.err (!%p132_p7)
}
  0x12   :  { %s163_s20 = smov 256   ;;  %s164_s21 = smov 16  }
  0x13   :  { %22 = dma.hbm_to_vmem [thread:$0]  %s220_s1, 256, %s17_s10, [#allocation3], %s163_s20, %s163_s20, %s164_s21  }
  0x14   :  { %158 = dma.done.wait [#allocation3], 1024  }
  0x15   :  { %159 = vsyncadd [#allocation3], 4294966272  ;;  %v165_v0 = vmov 0   ;;  %v34_v1 = vld [vmem:[%s219_s0] sm:$0xff]  ;;  %v42_v2 = vlaneseq  ;;  %v166_v3 = vmov 269488144  }
  0x16   :  { %113 = vset.pattern.permute.xlu0 %v165_v0  ;;  %v40_v4 = vunpack.c.l.s4 %v166_v3  ;;  %v167_v5 = vmov 842150450   ;;  %v168_v7 = vmov 1414812756   ;;  %v169_v9 = vmov 1987475062  }
  0x17   :  { %37 = vperm.xlu0 %113, %v34_v1   ;;  %v47_v6 = vunpack.c.l.s4 %v167_v5  ;;  %v54_v8 = vunpack.c.l.s4 %v168_v7  ;;  %v61_v10 = vunpack.c.l.s4 %v169_v9  ;;  %v43_v11 = vshrl.u32 %v42_v2, 7  ;;  %v26_v20 = vld [vmem:[#allocation2] sm:$0xff]  ;;  %v27_v21 = vld [vmem:[#allocation2 + $0x8] sm:$0xff]  ;;  %v28_v23 = vld [vmem:[#allocation2 + $0x10] sm:$0xff] }
  0x18   :  { %v41_v12 = vunpack.c.0.s8 %v40_v4  ;;  %v29_v24 = vld [vmem:[#allocation2 + $0x18] sm:$0xff]  ;;  %v30_v25 = vld [vmem:[#allocation2 + $0x20] sm:$0xff]  ;;  %v31_v26 = vld [vmem:[#allocation2 + $0x28] sm:$0xff] }
  0x19   :  { %v48_v13 = vunpack.c.0.s8 %v47_v6  ;;  %v55_v14 = vunpack.c.0.s8 %v54_v8  ;;  %v62_v15 = vunpack.c.0.s8 %v61_v10  ;;  %v32_v27 = vld [vmem:[#allocation2 + $0x30] sm:$0xff]  ;;  %v33_v28 = vld [vmem:[#allocation2 + $0x38] sm:$0xff] }
  0x1a   :  { %v44_v16 = vsub.s32 %v41_v12, %v43_v11 }
  0x1b   :  { %v51_v17 = vsub.s32 %v48_v13, %v43_v11  ;;  %v58_v18 = vsub.s32 %v55_v14, %v43_v11  ;;  %v65_v19 = vsub.s32 %v62_v15, %v43_v11 }
  0x96   :  { %v38_v22 = vpop.permute.xlu0 %37 }
  0x97   :  { %v45_v29 = vrot.slane %v38_v22, %v44_v16  ;;  %v52_v30 = vrot.slane %v38_v22, %v51_v17  ;;  %v59_v31 = vrot.slane %v38_v22, %v58_v18  ;;  %v66_v32 = vrot.slane %v38_v22, %v65_v19 }
  0x99   :  { %v71_v33 = vmul.f32 %v45_v29, %v26_v20  ;;  %v72_v34 = vmul.f32 %v45_v29, %v27_v21  ;;  %v73_v35 = vmul.f32 %v52_v30, %v28_v23  ;;  %v74_v36 = vmul.f32 %v52_v30, %v29_v24 }
  0x9a   :  { %v75_v37 = vmul.f32 %v59_v31, %v30_v25  ;;  %v76_v38 = vmul.f32 %v59_v31, %v31_v26  ;;  %v77_v39 = vmul.f32 %v66_v32, %v32_v27  ;;  %v78_v40 = vmul.f32 %v66_v32, %v33_v28 }
  0x9b   :  { %79 = vst [vmem:[#allocation5] sm:$0xff] %v71_v33  ;;  %80 = vst [vmem:[#allocation5 + $0x8] sm:$0xff] %v72_v34 }
  0x9c   :  { %81 = vst [vmem:[#allocation5 + $0x10] sm:$0xff] %v73_v35  ;;  %82 = vst [vmem:[#allocation5 + $0x18] sm:$0xff] %v74_v36 }
  0x9d   :  { %83 = vst [vmem:[#allocation5 + $0x20] sm:$0xff] %v75_v37  ;;  %84 = vst [vmem:[#allocation5 + $0x28] sm:$0xff] %v76_v38 }
  0x9e   :  { %85 = vst [vmem:[#allocation5 + $0x30] sm:$0xff] %v77_v39  ;;  %86 = vst [vmem:[#allocation5 + $0x38] sm:$0xff] %v78_v40 }
  0x9f   :  { %91 = vsyncadd [#allocation4], 768  ;;  %s170_s0 = smov [#allocation5]  }
  0xa0   :  { %s92_s1 = sshll.u32 %s170_s0, 4  ;;  %s93_s1 = int_to_ptr.vmem [resolvable:$true] %s92_s1 }
  0xa1   :  { %s136_s26 = scalar_lea.vmem %s93_s1, 256  ;;  %s140_s27 = scalar_lea.vmem %s93_s1, 1024 }
  0xa2   :  { %p137_p8 = scmp.ne.s32.totalorder %s93_s1, %s136_s26  ;;  %p141_p9 = scmp.lt.s32.totalorder %s93_s1, %s93_s1 }
  0xa3   :  { %p142_p10 = scmp.lt.s32.totalorder %s140_s27, %s136_s26 }
  0xa5   :  { %p143_p11 = por %p142_p10, %p141_p9 }
  0xa7   :  { %p144_p12 = pnand %p143_p11, %p137_p8 }
  0xa9   :  { %147 = shalt.err (!%p144_p12)
}
  0xaa   :  { %s148_s30 = scalar_lea.hbm %s221_s2, 256 }
  0xab   :  { %p149_p13 = scmp.ne.s32.totalorder %s221_s2, %s148_s30  ;;  %p152_p0 = scmp.lt.u32.totalorder %s148_s30, %s221_s2 }
  0xad   :  { %p154_p1 = pnand %p152_p0, %p149_p13 }
  0xaf   :  { %157 = shalt.err (!%p154_p1)
}
  0xb0   :  { %98 = dma.vmem_to_hbm [thread:$0]  %s93_s1, 256, %s221_s2, [#allocation4], %s163_s20, %s163_s20, %s164_s21  }
  0xb1   :  { %160 = dma.done.wait [#allocation4], 1024  }
  0xb2   :  { %161 = vsyncadd [#allocation4], 4294966272 }
  0xb3   :  { %102 = vsyncpa [#allocation3], 1 }
  0xb4   :  { %103 = vsyncpa [#allocation4], 1 }

</bundles_post_ra>
